<compile_context>
chip_gen: v7x
topology: tpu7x:2x2x1
jax: 0.10.0
libtpu: 0.0.40
codegen_flags: <defaults>
</compile_context>

<pallas_src>
import functools
import math

import jax
import jax.numpy as jnp
from jax.experimental import pallas as pl
from jax.experimental.pallas import tpu as pltpu


def _posenc_kernel(x_hbm_ref, o_ref, enc_ref, *, half, padded, tx):
    del x_hbm_ref  # encoding depends only on shape/dtype; the input is never read
    xt = pl.program_id(0)  # x-tile index ("parallel": sharded across TensorCores)
    b = pl.program_id(1)   # batch index ("arbitrary": innermost, sequential)

    @pl.when(b == 0)
    def _compute_tile():
        _, C, TX = o_ref.shape
        # Channel-dependent terms on a (C, 1) column: only C exp's on the EUP.
        c_col = jax.lax.broadcasted_iota(jnp.int32, (C, 1), 0).astype(jnp.float32)
        is_sin = c_col < float(half)
        freq_idx = jnp.where(is_sin, c_col, c_col - float(half))
        # inv_freq[k] = 10000 ** (-(2k) / padded)
        inv_freq = jnp.exp(freq_idx * (-2.0 * math.log(10000.0) / float(padded)))  # (C, 1)
        phase = jnp.where(is_sin, 0.0, 0.5 * math.pi)                              # (C, 1)

        # Absolute positions for this x-tile: (1, TX) row, offset by tile start.
        x_row = (jax.lax.broadcasted_iota(jnp.int32, (1, TX), 1) + xt * tx)
        x_row = x_row.astype(jnp.float32)

        # cos(a) == sin(a + pi/2): one transcendental per output element.
        ang = x_row * inv_freq + phase                                              # (C, TX)
        enc_ref[...] = jnp.sin(ang)[None, :, :].astype(enc_ref.dtype)

    # For every batch: pure VMEM -> HBM writeback (encoding identical across b).
    o_ref[...] = enc_ref[...]


def _choose_tx(X):
    """Lane-dense X tile: multiple of 128 dividing X, else take the full extent."""
    if X % 128 != 0:
        return X
    for tx in (2048, 1024, 512, 256, 128):
        if X % tx == 0:
            return tx
    return X


def positional_encoding_permute_1d(x):
    """x: (B, C, X) float array. Returns positional encoding of the same shape."""
    B, C, X = x.shape
    padded = int(math.ceil(C / 2) * 2)
    half = padded // 2
    tx = _choose_tx(X)
    num_xt = X // tx
    itemsize = jnp.dtype(x.dtype).itemsize

    kernel = functools.partial(_posenc_kernel, half=half, padded=padded, tx=tx)
    return pl.pallas_call(
        kernel,
        out_shape=jax.ShapeDtypeStruct((B, C, X), x.dtype),
        grid=(num_xt, B),
        # Input stays in HBM and is never touched: no DMA, no VMEM double-buffers.
        in_specs=[pl.BlockSpec(memory_space=pl.ANY)],
        out_specs=pl.BlockSpec((1, C, tx), lambda xt, b: (b, 0, xt)),
        scratch_shapes=[pltpu.VMEM((1, C, tx), x.dtype)],
        compiler_params=pltpu.CompilerParams(
            dimension_semantics=("parallel", "arbitrary")),
        cost_estimate=pl.CostEstimate(
            flops=2 * C * X,
            transcendentals=C * X + C,
            bytes_accessed=B * C * X * itemsize),
    )(x)


def _reference(x):
    """Pure-JAX reference mirroring the PyTorch module."""
    B, C, X = x.shape
    padded = int(math.ceil(C / 2) * 2)
    inv_freq = 1.0 / (10000.0 ** (jnp.arange(0, padded, 2, dtype=jnp.float32) / padded))
    pos = jnp.arange(X, dtype=jnp.float32)
    sin_inp = jnp.einsum("i,j->ij", pos, inv_freq)                         # (X, padded//2)
    emb = jnp.concatenate([jnp.sin(sin_inp), jnp.cos(sin_inp)], axis=-1)   # (X, padded)
    enc = jnp.broadcast_to(emb[None, :, :C], (B, X, C)).astype(x.dtype)    # (B, X, C)
    return jnp.transpose(enc, (0, 2, 1))                                   # (B, C, X)


if __name__ == "__main__":
    key = jax.random.PRNGKey(0)
    B, C, X = 2, 6, 16
    x = jax.random.normal(key, (B, C, X), dtype=jnp.float32)

    out = positional_encoding_permute_1d(x)
    out = jax.block_until_ready(out)

    ref = _reference(x)
    assert out.shape == (B, C, X)
    # Slightly relaxed tolerance: cos is computed as sin(a + pi/2) in-kernel.
    assert jnp.allclose(out, ref, atol=1e-4, rtol=1e-4), "mismatch vs reference"
    print("KERNEL_OK")
</pallas_src>

<mosaic_0001>
module attributes {stable_mosaic.version = 11 : i64} {
  func.func @_posenc_kernel(%arg0: i32, %arg1: i32, %arg2: memref<2x6x16xf32, #tpu.memory_space<any>>, %arg3: memref<1x6x16xf32, #tpu.memory_space<vmem>>, %arg4: memref<1x6x16xf32, #tpu.memory_space<vmem>>) attributes {dimension_semantics = [#tpu.dimension_semantics<parallel>, #tpu.dimension_semantics<arbitrary>], iteration_bounds = array<i64: 1, 2>, scalar_prefetch = 0 : i64, scratch_operands = 1 : i64, tpu.core_type = #tpu.core_type<tc>, window_params = [{}, {transform_indices = @transform_1, window_bounds = array<i64: 1, 6, 16>}]} {
    %c0_i32 = arith.constant 0 : i32
    %0 = arith.cmpi eq, %arg1, %c0_i32 : i32
    %1 = arith.extui %0 : i1 to i32
    %c0_i32_0 = arith.constant 0 : i32
    %2 = arith.cmpi ne, %1, %c0_i32_0 : i32
    scf.if %2 {
      %5 = tpu.iota {dimensions = array<i32: 0>} : vector<6x1xi32>
      %6 = arith.sitofp %5 : vector<6x1xi32> to vector<6x1xf32>
      %cst = arith.constant 3.000000e+00 : f32
      %7 = vector.broadcast %cst : f32 to vector<6x1xf32>
      %8 = arith.cmpf olt, %6, %7 : vector<6x1xf32>
      %cst_6 = arith.constant 3.000000e+00 : f32
      %9 = vector.broadcast %cst_6 : f32 to vector<6x1xf32>
      %10 = arith.subf %6, %9 : vector<6x1xf32>
      %11 = arith.select %8, %6, %10 : vector<6x1xi1>, vector<6x1xf32>
      %cst_7 = arith.constant -3.07011342 : f32
      %12 = vector.broadcast %cst_7 : f32 to vector<6x1xf32>
      %13 = arith.mulf %11, %12 : vector<6x1xf32>
      %14 = math.exp %13 : vector<6x1xf32>
      %cst_8 = arith.constant 0.000000e+00 : f32
      %cst_9 = arith.constant 1.57079637 : f32
      %15 = vector.broadcast %cst_8 : f32 to vector<6x1xf32>
      %16 = vector.broadcast %cst_9 : f32 to vector<6x1xf32>
      %17 = arith.select %8, %15, %16 : vector<6x1xi1>, vector<6x1xf32>
      %18 = tpu.iota {dimensions = array<i32: 1>} : vector<1x16xi32>
      %c16_i32 = arith.constant 16 : i32
      %19 = arith.muli %arg0, %c16_i32 : i32
      %20 = vector.broadcast %19 : i32 to vector<1x16xi32>
      %21 = arith.addi %18, %20 : vector<1x16xi32>
      %22 = arith.sitofp %21 : vector<1x16xi32> to vector<1x16xf32>
      %23 = vector.broadcast %22 : vector<1x16xf32> to vector<6x16xf32>
      %24 = vector.broadcast %14 : vector<6x1xf32> to vector<6x16xf32>
      %25 = arith.mulf %23, %24 : vector<6x16xf32>
      %26 = vector.broadcast %17 : vector<6x1xf32> to vector<6x16xf32>
      %27 = arith.addf %25, %26 : vector<6x16xf32>
      %28 = math.sin %27 : vector<6x16xf32>
      %29 = vector.shape_cast %28 : vector<6x16xf32> to vector<1x6x16xf32>
      %c0_10 = arith.constant 0 : index
      %c0_11 = arith.constant 0 : index
      %c0_12 = arith.constant 0 : index
      %30 = vector.load %arg4[%c0_10, %c0_11, %c0_12] : memref<1x6x16xf32, #tpu.memory_space<vmem>>, vector<1x6x16xf32>
      tpu.vector_store %arg4[%c0_10, %c0_11, %c0_12], %29 {strides = array<i32>} : memref<1x6x16xf32, #tpu.memory_space<vmem>>, vector<1x6x16xf32>,
    } else {
    }
    %c0 = arith.constant 0 : index
    %c0_1 = arith.constant 0 : index
    %c0_2 = arith.constant 0 : index
    %3 = vector.load %arg4[%c0, %c0_1, %c0_2] : memref<1x6x16xf32, #tpu.memory_space<vmem>>, vector<1x6x16xf32>
    %c0_3 = arith.constant 0 : index
    %c0_4 = arith.constant 0 : index
    %c0_5 = arith.constant 0 : index
    %4 = vector.load %arg3[%c0_3, %c0_4, %c0_5] : memref<1x6x16xf32, #tpu.memory_space<vmem>>, vector<1x6x16xf32>
    tpu.vector_store %arg3[%c0_3, %c0_4, %c0_5], %3 {strides = array<i32>} : memref<1x6x16xf32, #tpu.memory_space<vmem>>, vector<1x6x16xf32>,
    return
  }
  func.func @transform_1(%arg0: i32, %arg1: i32) -> (i32, i32, i32) {
    %c0_i32 = arith.constant 0 : i32
    %c0_i32_0 = arith.constant 0 : i32
    return %arg1, %c0_i32, %arg0 : i32, i32, i32
  }
}

</mosaic_0001>

<bundles_post_ra>
// kernel: tpu_custom_call.1
= control target key start
LH: loop header
LB: loop body
LE: loop exit
PB: predicated region body
PF: predicated region fallthrough
CT: control target
= control target key end

     0   :  { %s324_s6 = smov 0   ;;  %s326_s7 = smov 0   ;;  %s368_s0 = inlined_call_operand.vmem [shape: f32[2,6,16], index: 0, kind: input, shape index: {}]   ;;  %s369_s1 = inlined_call_operand.vmem [shape: f32[2,6,16], index: 1, kind: output, shape index: {}]  }
   0x1 LB: > { %s17_s8 = sadd.s32 1, %s301_s6  ;;  %p248_p1 = scmp.ge.s32.totalorder %s305_s7, 2  ;;  %s305_s7 = sphi %s326_s7, %s11_s7   ;;  %s301_s6 = sphi %s324_s6, %s370_s6  }
   0x2   : > { %p18_p0 = scmp.ge.s32.totalorder %s17_s8, 2  ;;  %p58_p2 = scmp.lt.s32.totalorder (!%p248_p1), %s301_s6, 1 }
   0x3   : > { %48 = sbr.rel (%p248_p1) target bundleno = 128 (0x80), region = 12  ;;  %p250_p3 = scmp.ne.s32.totalorder (!%p248_p1), %s301_s6, 0 }
   0x4   : > { %s372_s8 = smov (%p18_p0, %s17_s8), 0 }
   0xa   : > { %s59_s0 = scalar_select %p58_p2, %s301_s6, 1 }
   0xb   : > { %68 = sbr.rel (%p250_p3) target bundleno = 120 (0x78), region = 16  ;;  %v69_v0 = vlaneseq (!%p250_p3)  ;;  %v307_v10 = vmov (!%p250_p3), 1.5707964   ;;  %v308_v25 = vmov (!%p250_p3), 683565275   ;;  %vm191_vm14 = vcmask (!%p250_p3), 128000  }
   0xc   : > { %s249_s9 = sshll.u32 %s59_s0, 3  ;;  %v309_v27 = vmov (!%p250_p3), 2475754826   ;;  %v310_v29 = vmov (!%p250_p3), 2131351028  }
   0xd   : > { %s338_s12 = scalar_lea.vmem %s369_s1, %s249_s9  ;;  %v70_v1 = vshrl.u32 (!%p250_p3), %v69_v0, 7  ;;  %v80_v7 = vand.u32 (!%p250_p3), 127, %v69_v0  ;;  %v311_v31 = vmov (!%p250_p3), 2102212464   ;;  %v312_v33 = vmov (!%p250_p3), 920167782  }
   0xe   : > { %v313_v40 = vmov (!%p250_p3), 1326507024  }
   0xf   : > { %v71_v2 = vcvt.s32.f32 (!%p250_p3), %v70_v1  ;;  %v84_v8 = vcvt.s32.f32 (!%p250_p3), %v80_v7 }
  0x11   : > { %vm72_vm0 = vcmp.lt.f32.partialorder (!%p250_p3), %v71_v2, 3.0  ;;  %v251_v3 = vadd.f32 (!%p250_p3), -3.0, %v71_v2 }
  0x12   : > { %v78_v11 = vsel %vm72_vm0, 0.0, %v307_v10 }
  0x13   : > { %v74_v4 = vsel %vm72_vm0, %v71_v2, %v251_v3 }
  0x14   : > { %v75_v5 = vmul.f32 -3.0701134, %v74_v4 }
  0x16   : > { %v76_v6 = vmul.f32 1.442695, %v75_v5 }
  0x18   : > { %285 = vpow2.f32 %v76_v6 }
  0x22   : > { %v286_v9 = vpop.eup %285 }
  0x23   : > { %v85_v12 = vmul.f32 %v286_v9, %v84_v8 }
  0x25   : > { %v340_v13 = vadd.f32 %v85_v12, %v78_v11 }
  0x27   : > { %v90_v14 = vand.u32 2139095040, %v340_v13  ;;  %v87_v16 = vand.u32 2147483647, %v340_v13  ;;  %vm89_vm8 = vcmp.lt.s32.totalorder %v340_v13, 0  ;;  %vm179_vm13 = vweird.f32 %v340_v13 }
  0x29   : > { %v91_v15 = vshrl.u32 %v90_v14, 23  ;;  %v94_v19 = vand.u32 8388607, %v87_v16  ;;  %vm88_vm9 = vcmp.le.f32.partialorder %v87_v16, 0.7853982 }
  0x2b   : > { %v252_v17 = vadd.s32 4294967169, %v91_v15  ;;  %v95_v22 = vor.u32 8388608, %v94_v19 }
  0x2d   : > { %v97_v18 = vadd.s32 1, %v252_v17  ;;  %v135_v42 = vshll.u32 %v95_v22, 8 }
  0x2f   : > { %vm98_vm1 = vcmp.gt.s32.totalorder %v97_v18, 0 }
  0x30   : > { %v99_v20 = vsel %vm98_vm1, %v97_v18, 0 }
  0x31   : > { %v101_v21 = vand.u32 31, %v99_v20  ;;  %v100_v23 = vshrl.u32 %v99_v20, 5 }
  0x33   : > { %v102_v24 = vsub.s32 32, %v101_v21  ;;  %v104_v26 = vshll.u32 %v308_v25, %v101_v21  ;;  %v107_v28 = vshll.u32 %v309_v27, %v101_v21  ;;  %v110_v30 = vshll.u32 %v310_v29, %v101_v21 }
  0x34   : > { %v113_v32 = vshll.u32 %v311_v31, %v101_v21  ;;  %v116_v34 = vshll.u32 %v312_v33, %v101_v21  ;;  %vm119_vm2 = vcmp.lt.s32.totalorder %v100_v23, 1  ;;  %vm122_vm3 = vcmp.lt.s32.totalorder %v100_v23, 4 }
  0x35   : > { %v103_v35 = vshrl.u32 %v308_v25, %v102_v24  ;;  %v105_v36 = vshrl.u32 %v309_v27, %v102_v24  ;;  %v108_v37 = vshrl.u32 %v310_v29, %v102_v24  ;;  %v111_v38 = vshrl.u32 %v311_v31, %v102_v24 }
  0x36   : > { %v114_v39 = vshrl.u32 %v312_v33, %v102_v24  ;;  %v117_v41 = vshrl.u32 %v313_v40, %v102_v24  ;;  %vm120_vm4 = vcmp.lt.s32.totalorder %v100_v23, 2  ;;  %vm121_vm5 = vcmp.lt.s32.totalorder %v100_v23, 3 }
  0x37   : > { %v106_v43 = vor.u32 %v105_v36, %v104_v26  ;;  %v109_v44 = vor.u32 %v108_v37, %v107_v28  ;;  %v112_v45 = vor.u32 %v111_v38, %v110_v30 }
  0x38   : > { %v115_v46 = vor.u32 %v114_v39, %v113_v32  ;;  %v118_v47 = vor.u32 %v117_v41, %v116_v34 }
  0x39   : > { %v123_v48 = vsel %vm119_vm2, %v103_v35, %v106_v43  ;;  %v124_v49 = vsel %vm122_vm3, %v112_v45, 2102212464  ;;  %v127_v50 = vsel %vm119_vm2, %v106_v43, %v109_v44  ;;  %v131_v51 = vsel %vm119_vm2, %v109_v44, %v112_v45 }
  0x3a   : > { %v125_v52 = vsel %vm121_vm5, %v109_v44, %v124_v49  ;;  %v128_v53 = vsel %vm122_vm3, %v115_v46, 920167782  ;;  %v132_v54 = vsel %vm122_vm3, %v118_v47, 1326507024 }
  0x3b   : > { %v129_v55 = vsel %vm121_vm5, %v112_v45, %v128_v53  ;;  %v133_v56 = vsel %vm121_vm5, %v115_v46, %v132_v54  ;;  %v126_v57 = vsel %vm120_vm4, %v123_v48, %v125_v52 }
  0x3c   : > { %v130_v58 = vsel %vm120_vm4, %v127_v50, %v129_v55  ;;  %v134_v59 = vsel %vm120_vm4, %v131_v51, %v133_v56  ;;  %v142_v0 = vmul.u32 %v135_v42, %v126_v57 }
  0x3d   : > { %v346_v60 = vmul.u32.u64.low %v135_v42, %v134_v59  ;;  %v347_v61 = vmul.u32.u64.high %v135_v42, %v134_v59, %v346_v60  ;;  %v349_v62 = vmul.u32.u64.low %v135_v42, %v130_v58  ;;  %v350_v63 = vmul.u32.u64.high %v135_v42, %v130_v58, %v349_v62 }
  0x3f   : > { %vm144_vm6 = vc.u32 %v347_v61, %v349_v62  ;;  %v145_v1 = vadd.s32 1, %v350_v63  ;;  %v143_v12 = vadd.s32 %v349_v62, %v347_v61 }
  0x41   : > { %v146_v2 = vsel %vm144_vm6, %v145_v1, %v350_v63 }
  0x42   : > { %v147_v3 = vadd.s32 %v146_v2, %v142_v0 }
  0x44   : > { %v148_v4 = vadd.s32 536870912, %v147_v3 }
  0x46   : > { %v149_v5 = vshrl.u32 %v148_v4, 30 }
  0x48   : > { %v150_v6 = vshll.u32 %v149_v5, 30  ;;  %v173_v26 = vsub.s32 4, %v149_v5 }
  0x4a   : > { %v151_v7 = vsub.s32 %v147_v3, %v150_v6  ;;  %v174_v29 = vsel %vm89_vm8, %v173_v26, %v149_v5 }
  0x4b   : > { %v176_v32 = vsel %vm88_vm9, 0, %v174_v29 }
  0x4c   : > { %v153_v8 = vsub.s32 0, %v151_v7  ;;  %v180_v33 = vadd.s32 3, %v176_v32 }
  0x4e   : > { %v253_v9 = vmin.u32 %v153_v8, %v151_v7  ;;  %v181_v34 = vand.u32 3, %v180_v33 }
  0x50   : > { %v155_v10 = vclz %v253_v9  ;;  %vm186_vm10 = vcmp.eq.s32.totalorder %v181_v34, 2  ;;  %vm183_vm11 = vcmp.eq.s32.totalorder %v181_v34, 0  ;;  %vm182_vm12 = vcmp.lt.s32.totalorder %v181_v34, 2 }
  0x52   : > { %v254_v11 = vadd.s32 4294967294, %v155_v10 }
  0x54   : > { %vm255_vm7 = vcmp.lt.s32.totalorder %v254_v11, 0 }
  0x55   : > { %v158_v14 = vsel %vm255_vm7, 0, %v254_v11 }
  0x56   : > { %v159_v15 = vsub.s32 32, %v158_v14  ;;  %v160_v17 = vshll.u32 %v151_v7, %v158_v14  ;;  %v163_v18 = vsub.s32 4294967266, %v158_v14 }
  0x58   : > { %v161_v19 = vshrl.u32 %v143_v12, %v159_v15  ;;  %v164_v20 = vadd.s32 127, %v163_v18 }
  0x5a   : > { %v162_v21 = vor.u32 %v161_v19, %v160_v17  ;;  %v165_v22 = vshll.u32 %v164_v20, 23 }
  0x5c   : > { %v166_v23 = vor.u32 4788187, %v165_v22  ;;  %v169_v24 = vcvt.s32.f32 %v162_v21 }
  0x5e   : > { %v167_v25 = vand.u32 2147483647, %v166_v23 }
  0x60   : > { %v170_v27 = vmul.f32 %v169_v24, %v167_v25 }
  0x62   : > { %v171_v28 = vxor.u32 2147483648, %v170_v27 }
  0x64   : > { %v172_v30 = vsel %vm89_vm8, %v171_v28, %v170_v27 }
  0x65   : > { %v175_v31 = vsel %vm88_vm9, %v340_v13, %v172_v30 }
  0x66   : > { %287 = vcosq.f32 %v175_v31 }
  0x67   : > { %289 = vsinq.f32 %v175_v31 }
  0x70   : > { %v288_v35 = vpop.eup %287 }
  0x71   : > { %v290_v36 = vpop.eup %289  ;;  %v187_v37 = vxor.u32 2147483648, %v288_v35 }
  0x72   : > { %v184_v38 = vxor.u32 2147483648, %v290_v36 }
  0x73   : > { %v188_v16 = vsel %vm186_vm10, %v187_v37, %v290_v36 }
  0x74   : > { %v185_v39 = vsel %vm183_vm11, %v288_v35, %v184_v38 }
  0x75   : > { %v189_v40 = vsel %vm182_vm12, %v185_v39, %v188_v16 }
  0x76   : > { %v190_v41 = vsel %vm179_vm13, nan, %v189_v40 }
  0x77   : > { %192 = vst.msk [vmem:[#allocation2] sm:$0x3f] %vm191_vm14, %v190_v41 }
  0x78 PF: > { %vm194_vm15 = vcmask 128000  }
  0x7e   : > { %v193_v42 = vld [vmem:[#allocation2] sm:$0x3f] }
  0x7f   : > { %195 = vst.msk [vmem:[%s338_s12] sm:$0x3f] %vm194_vm15, %v193_v42 }
  0x80 PF: > { %s11_s7 = sadd.s32 1, %s305_s7   ;;  %s370_s6 = smov %s372_s8 }
  0x81   : > { %p8_p4 = scmp.ge.s32.totalorder %s11_s7, 3  }
  0x83   :  { %10 = sbr.rel (!%p8_p4) target bundleno = 1 (0x1), region = 43 }

</bundles_post_ra>
